<compile_context>
chip_gen: v6e
topology: v6e:2x2x1
jax: 0.10.0
libtpu: 0.0.40
codegen_flags: <defaults>
</compile_context>

<pallas_src>
import functools

import jax
import jax.numpy as jnp
from jax.experimental import pallas as pl
from jax.experimental.pallas import tpu as pltpu

_LANES = 128
_SUBLANES = 8
_MIN_TILE_ELEMS = _SUBLANES * _LANES        # 1024 elements = one (8,128) tile
_TARGET_BLOCK_BYTES = 1 << 20               # ~1 MiB per input block


def _reconstruct_loss_kernel(fake_ref, real_ref, mask_ref,
                             absdiff_ref, valid_ref,
                             *, tile_rows, rows, blocks_per_split,
                             n_row_blocks, mask_last):
    s = pl.program_id(0)   # split (TensorCore on v7x)
    j = pl.program_id(1)   # reduction step within the split

    # The output blocks are resident across the whole j loop (index map is
    # constant in j): zero them on the first step of each split.
    @pl.when(j == 0)
    def _():
        absdiff_ref[...] = jnp.zeros_like(absdiff_ref)
        valid_ref[...] = jnp.zeros_like(valid_ref)

    def accumulate(masked):
        f = fake_ref[...].astype(jnp.float32)
        r = real_ref[...].astype(jnp.float32)
        m = mask_ref[...].astype(jnp.float32)
        d = jnp.abs(f - r)
        if masked:
            # Ragged last block: zero rows beyond the true row count.  Select
            # (not multiply-by-zero) BEFORE the m*d multiply so unspecified
            # out-of-bounds data -- even NaN -- cannot leak into either sum.
            block_idx = s * blocks_per_split + j
            row_ids = block_idx * tile_rows + jax.lax.broadcasted_iota(
                jnp.int32, (tile_rows, 1), 0)
            in_bounds = row_ids < rows
            d = jnp.where(in_bounds, d, 0.0)
            m = jnp.where(in_bounds, m, 0.0)
        vm = m * d
        # Fold the (tile_rows,128) tile into the resident (8,128) output
        # blocks with pure VPU adds (no cross-lane/XLU reduce in the loop).
        absdiff_ref[...] += jnp.sum(
            d.reshape(tile_rows // _SUBLANES, _SUBLANES, _LANES), axis=0)
        valid_ref[...] += jnp.sum(
            vm.reshape(tile_rows // _SUBLANES, _SUBLANES, _LANES), axis=0)

    if mask_last:
        last = n_row_blocks - 1
        block_idx = s * blocks_per_split + j

        @pl.when(block_idx == last)
        def _():
            accumulate(True)

        @pl.when(block_idx != last)
        def _():
            accumulate(False)
    else:
        # Common case (aligned shapes): no masking code emitted at all.
        accumulate(False)


def _pick_tile_rows(rows, itemsize):
    """Dtype-scaled tile height (~1 MiB/block); prefer an exact divisor."""
    target = max(_SUBLANES,
                 (_TARGET_BLOCK_BYTES // (itemsize * _LANES))
                 // _SUBLANES * _SUBLANES)
    if rows <= target:
        return rows
    # Prefer a tile that divides rows exactly (no ragged last block, hence no
    # in-kernel masking); accept anything down to half the target size.
    t = target
    floor = max(_SUBLANES, target // 2)
    while t >= floor:
        if rows % t == 0:
            return t
        t -= _SUBLANES
    return target


@jax.jit
def reconstruct_loss(fake_img, real_img, mask):
    """Returns (L_hole, L_valid) as float32 scalars (mean over ALL elements).

    Note: relies on |(1-m)(f-r)| == (1-m)|f-r| and |m(f-r)| == m|f-r|, which
    is exact for mask values in [0, 1] (the module's binary mask).
    """
    assert fake_img.shape == real_img.shape == mask.shape
    n_true = fake_img.size
    itemsize = jnp.dtype(fake_img.dtype).itemsize

    fake_flat = jnp.reshape(fake_img, (-1,))
    real_flat = jnp.reshape(real_img, (-1,))
    mask_flat = jnp.reshape(mask, (-1,))

    # Aligned prefix goes through the kernel; the <1024-element tail (if any)
    # is folded in with plain jnp ops below -- no full-array jnp.pad copy.
    rem = n_true % _MIN_TILE_ELEMS
    n_main = n_true - rem

    if n_main == 0:
        # Tiny input (< one (8,128) tile): pad just this tile with zeros
        # (zeros contribute 0 to both sums; the mean uses n_true).
        pad = _MIN_TILE_ELEMS - n_true
        fake_main = jnp.pad(fake_flat, (0, pad))
        real_main = jnp.pad(real_flat, (0, pad))
        mask_main = jnp.pad(mask_flat, (0, pad))
        n_main, rem = _MIN_TILE_ELEMS, 0
    else:
        fake_main = fake_flat[:n_main]
        real_main = real_flat[:n_main]
        mask_main = mask_flat[:n_main]

    fake2d = jnp.reshape(fake_main, (-1, _LANES))
    real2d = jnp.reshape(real_main, (-1, _LANES))
    mask2d = jnp.reshape(mask_main, (-1, _LANES))

    rows = fake2d.shape[0]                       # multiple of 8
    tile_rows = _pick_tile_rows(rows, itemsize)  # multiple of 8, <= rows
    n_row_blocks = pl.cdiv(rows, tile_rows)
    mask_last = (rows % tile_rows) != 0

    # Even split across the leading "parallel" axis (v7x megacore) only when
    # it is exact -> never a duplicated or imbalanced block.  On v5e/v6e the
    # axis is just a serial outer loop with identical total work.
    num_splits = 2 if (n_row_blocks % 2 == 0) else 1
    blocks_per_split = n_row_blocks // num_splits

    in_spec = pl.BlockSpec((tile_rows, _LANES),
                           lambda s, j: (s * blocks_per_split + j, 0))
    # Per-split (8,128) partial-sum slab; lane-dense, resident across j.
    out_spec = pl.BlockSpec((_SUBLANES, _LANES), lambda s, j: (s, 0))
    out_shape = jax.ShapeDtypeStruct((num_splits * _SUBLANES, _LANES),
                                     jnp.float32)

    kernel = functools.partial(
        _reconstruct_loss_kernel,
        tile_rows=tile_rows,
        rows=rows,
        blocks_per_split=blocks_per_split,
        n_row_blocks=n_row_blocks,
        mask_last=mask_last,
    )

    cost = pl.CostEstimate(
        flops=4 * n_main,
        transcendentals=0,
        bytes_accessed=3 * n_main * itemsize
        + 2 * num_splits * _SUBLANES * _LANES * 4,
    )

    absdiff_parts, valid_parts = pl.pallas_call(
        kernel,
        out_shape=(out_shape, out_shape),
        grid_spec=pltpu.PrefetchScalarGridSpec(
            num_scalar_prefetch=0,
            grid=(num_splits, blocks_per_split),
            in_specs=[in_spec, in_spec, in_spec],
            out_specs=[out_spec, out_spec],
        ),
        compiler_params=pltpu.CompilerParams(
            dimension_semantics=("parallel", "arbitrary")),
        cost_estimate=cost,
    )(fake2d, real2d, mask2d)

    sum_d = jnp.sum(absdiff_parts)       # sum |f - r|
    sum_vm = jnp.sum(valid_parts)        # sum mask * |f - r|

    if rem:
        # Fold the unaligned tail (< 1024 elements) with plain jnp ops.
        f_t = fake_flat[n_main:].astype(jnp.float32)
        r_t = real_flat[n_main:].astype(jnp.float32)
        m_t = mask_flat[n_main:].astype(jnp.float32)
        d_t = jnp.abs(f_t - r_t)
        sum_d = sum_d + jnp.sum(d_t)
        sum_vm = sum_vm + jnp.sum(m_t * d_t)

    inv_n = 1.0 / float(n_true)
    l_valid = sum_vm * inv_n
    l_hole = (sum_d - sum_vm) * inv_n    # exact by linearity for mask in [0,1]
    return l_hole, l_valid


def _reference(fake_img, real_img, mask):
    inv_m = 1.0 - mask
    l_hole = jnp.mean(jnp.abs(inv_m * fake_img - inv_m * real_img))
    l_valid = jnp.mean(jnp.abs(mask * fake_img - mask * real_img))
    return l_hole, l_valid


if __name__ == "__main__":
    key = jax.random.PRNGKey(0)
    k1, k2, k3 = jax.random.split(key, 3)

    # NCHW inputs, small shapes: batch=2, channels=4, spatial=16x16.
    B, C, H, W = 2, 4, 16, 16
    fake_img = jax.random.normal(k1, (B, C, H, W), dtype=jnp.float32)
    real_img = jax.random.normal(k2, (B, C, H, W), dtype=jnp.float32)
    # Binary mask: 1 = valid pixel, 0 = hole.
    mask = (jax.random.uniform(k3, (B, C, H, W)) > 0.5).astype(jnp.float32)

    l_hole, l_valid = jax.block_until_ready(
        reconstruct_loss(fake_img, real_img, mask))

    ref_hole, ref_valid = _reference(fake_img, real_img, mask)
    assert jnp.allclose(l_hole, ref_hole, rtol=1e-5, atol=1e-6), (l_hole, ref_hole)
    assert jnp.allclose(l_valid, ref_valid, rtol=1e-5, atol=1e-6), (l_valid, ref_valid)

    print("KERNEL_OK")
</pallas_src>

<mosaic_0001>
module attributes {stable_mosaic.version = 11 : i64} {
  func.func @_reconstruct_loss_kernel(%arg0: i32, %arg1: i32, %arg2: memref<16x128xf32, #tpu.memory_space<vmem>>, %arg3: memref<16x128xf32, #tpu.memory_space<vmem>>, %arg4: memref<16x128xf32, #tpu.memory_space<vmem>>, %arg5: memref<8x128xf32, #tpu.memory_space<vmem>>, %arg6: memref<8x128xf32, #tpu.memory_space<vmem>>) attributes {dimension_semantics = [#tpu.dimension_semantics<parallel>, #tpu.dimension_semantics<arbitrary>], iteration_bounds = array<i64: 1, 1>, scalar_prefetch = 0 : i64, scratch_operands = 0 : i64, tpu.core_type = #tpu.core_type<tc>, window_params = [{transform_indices = @transform_0, window_bounds = array<i64: 16, 128>}, {transform_indices = @transform_1, window_bounds = array<i64: 16, 128>}, {transform_indices = @transform_2, window_bounds = array<i64: 16, 128>}, {transform_indices = @transform_3, window_bounds = array<i64: 8, 128>}, {transform_indices = @transform_4, window_bounds = array<i64: 8, 128>}]} {
    %c0_i32 = arith.constant 0 : i32
    %0 = arith.cmpi eq, %arg1, %c0_i32 : i32
    %1 = arith.extui %0 : i1 to i32
    %c0_i32_0 = arith.constant 0 : i32
    %2 = arith.cmpi ne, %1, %c0_i32_0 : i32
    scf.if %2 {
      %cst_15 = arith.constant 0.000000e+00 : f32
      %19 = vector.broadcast %cst_15 : f32 to vector<8x128xf32>
      %c0_16 = arith.constant 0 : index
      %c0_17 = arith.constant 0 : index
      %20 = vector.load %arg5[%c0_16, %c0_17] : memref<8x128xf32, #tpu.memory_space<vmem>>, vector<8x128xf32>
      tpu.vector_store %arg5[%c0_16, %c0_17], %19 {strides = array<i32>} : memref<8x128xf32, #tpu.memory_space<vmem>>, vector<8x128xf32>,
      %cst_18 = arith.constant 0.000000e+00 : f32
      %21 = vector.broadcast %cst_18 : f32 to vector<8x128xf32>
      %c0_19 = arith.constant 0 : index
      %c0_20 = arith.constant 0 : index
      %22 = vector.load %arg6[%c0_19, %c0_20] : memref<8x128xf32, #tpu.memory_space<vmem>>, vector<8x128xf32>
      tpu.vector_store %arg6[%c0_19, %c0_20], %21 {strides = array<i32>} : memref<8x128xf32, #tpu.memory_space<vmem>>, vector<8x128xf32>,
    } else {
    }
    %c0 = arith.constant 0 : index
    %c0_1 = arith.constant 0 : index
    %3 = vector.load %arg2[%c0, %c0_1] : memref<16x128xf32, #tpu.memory_space<vmem>>, vector<16x128xf32>
    %c0_2 = arith.constant 0 : index
    %c0_3 = arith.constant 0 : index
    %4 = vector.load %arg3[%c0_2, %c0_3] : memref<16x128xf32, #tpu.memory_space<vmem>>, vector<16x128xf32>
    %c0_4 = arith.constant 0 : index
    %c0_5 = arith.constant 0 : index
    %5 = vector.load %arg4[%c0_4, %c0_5] : memref<16x128xf32, #tpu.memory_space<vmem>>, vector<16x128xf32>
    %6 = arith.subf %3, %4 : vector<16x128xf32>
    %7 = math.absf %6 : vector<16x128xf32>
    %8 = arith.mulf %5, %7 : vector<16x128xf32>
    %c0_6 = arith.constant 0 : index
    %c0_7 = arith.constant 0 : index
    %9 = vector.load %arg5[%c0_6, %c0_7] : memref<8x128xf32, #tpu.memory_space<vmem>>, vector<8x128xf32>
    %10 = vector.shape_cast %7 : vector<16x128xf32> to vector<2x8x128xf32>
    %cst = arith.constant dense<0.000000e+00> : vector<8x128xf32>
    %11 = vector.multi_reduction <add>, %10, %cst [0] : vector<2x8x128xf32> to vector<8x128xf32>
    %12 = arith.addf %9, %11 : vector<8x128xf32>
    %c0_8 = arith.constant 0 : index
    %c0_9 = arith.constant 0 : index
    %13 = vector.load %arg5[%c0_8, %c0_9] : memref<8x128xf32, #tpu.memory_space<vmem>>, vector<8x128xf32>
    tpu.vector_store %arg5[%c0_8, %c0_9], %12 {strides = array<i32>} : memref<8x128xf32, #tpu.memory_space<vmem>>, vector<8x128xf32>,
    %c0_10 = arith.constant 0 : index
    %c0_11 = arith.constant 0 : index
    %14 = vector.load %arg6[%c0_10, %c0_11] : memref<8x128xf32, #tpu.memory_space<vmem>>, vector<8x128xf32>
    %15 = vector.shape_cast %8 : vector<16x128xf32> to vector<2x8x128xf32>
    %cst_12 = arith.constant dense<0.000000e+00> : vector<8x128xf32>
    %16 = vector.multi_reduction <add>, %15, %cst_12 [0] : vector<2x8x128xf32> to vector<8x128xf32>
    %17 = arith.addf %14, %16 : vector<8x128xf32>
    %c0_13 = arith.constant 0 : index
    %c0_14 = arith.constant 0 : index
    %18 = vector.load %arg6[%c0_13, %c0_14] : memref<8x128xf32, #tpu.memory_space<vmem>>, vector<8x128xf32>
    tpu.vector_store %arg6[%c0_13, %c0_14], %17 {strides = array<i32>} : memref<8x128xf32, #tpu.memory_space<vmem>>, vector<8x128xf32>,
    return
  }
  func.func @transform_0(%arg0: i32, %arg1: i32) -> (i32, i32) {
    %c1_i32 = arith.constant 1 : i32
    %0 = arith.muli %arg0, %c1_i32 : i32
    %1 = arith.addi %0, %arg1 : i32
    %c0_i32 = arith.constant 0 : i32
    %c0_i32_0 = arith.constant 0 : i32
    return %1, %c0_i32 : i32, i32
  }
  func.func @transform_1(%arg0: i32, %arg1: i32) -> (i32, i32) {
    %c1_i32 = arith.constant 1 : i32
    %0 = arith.muli %arg0, %c1_i32 : i32
    %1 = arith.addi %0, %arg1 : i32
    %c0_i32 = arith.constant 0 : i32
    %c0_i32_0 = arith.constant 0 : i32
    return %1, %c0_i32 : i32, i32
  }
  func.func @transform_2(%arg0: i32, %arg1: i32) -> (i32, i32) {
    %c1_i32 = arith.constant 1 : i32
    %0 = arith.muli %arg0, %c1_i32 : i32
    %1 = arith.addi %0, %arg1 : i32
    %c0_i32 = arith.constant 0 : i32
    %c0_i32_0 = arith.constant 0 : i32
    return %1, %c0_i32 : i32, i32
  }
  func.func @transform_3(%arg0: i32, %arg1: i32) -> (i32, i32) {
    %c0_i32 = arith.constant 0 : i32
    %c0_i32_0 = arith.constant 0 : i32
    return %arg0, %c0_i32 : i32, i32
  }
  func.func @transform_4(%arg0: i32, %arg1: i32) -> (i32, i32) {
    %c0_i32 = arith.constant 0 : i32
    %c0_i32_0 = arith.constant 0 : i32
    return %arg0, %c0_i32 : i32, i32
  }
}

</mosaic_0001>

<bundles_post_ra>
// kernel: reconstruct_loss.1
= control target key start
LH: loop header
LB: loop body
LE: loop exit
PB: predicated region body
PF: predicated region fallthrough
CT: control target
= control target key end

     0   :  { %s184_s0 = inlined_call_operand.vmem [shape: f32[16,128], index: 0, kind: input, shape index: {}]   ;;  %s185_s1 = inlined_call_operand.vmem [shape: f32[16,128], index: 1, kind: input, shape index: {}]   ;;  %s186_s2 = inlined_call_operand.vmem [shape: f32[16,128], index: 2, kind: input, shape index: {}]   ;;  %s187_s3 = inlined_call_operand.vmem [shape: f32[8,128], index: 3, kind: output, shape index: {0}]   ;;  %s188_s4 = inlined_call_operand.vmem [shape: f32[8,128], index: 4, kind: output, shape index: {1}]  }
   0x1   :  { %v88_v0 = vld [vmem:[%s184_s0] sm:$0xff]  ;;  %v89_v1 = vld [vmem:[%s184_s0 + $0x8] sm:$0xff] }
   0x2   :  { %v90_v2 = vld [vmem:[%s185_s1] sm:$0xff]  ;;  %v91_v3 = vld [vmem:[%s185_s1 + $0x8] sm:$0xff] }
   0x3   :  { %v94_v4 = vsub.f32 %v88_v0, %v90_v2  ;;  %v95_v5 = vsub.f32 %v89_v1, %v91_v3  ;;  %v92_v6 = vld [vmem:[%s186_s2] sm:$0xff]  ;;  %v93_v8 = vld [vmem:[%s186_s2 + $0x8] sm:$0xff] }
   0x5   :  { %v96_v7 = vand.u32 2147483647, %v94_v4  ;;  %v97_v9 = vand.u32 2147483647, %v95_v5 }
   0x7   :  { %v98_v10 = vmul.f32 %v96_v7, %v92_v6  ;;  %v101_v11 = vadd.f32 %v97_v9, %v96_v7  ;;  %v99_v12 = vmul.f32 %v97_v9, %v93_v8 }
   0x9   :  { %v105_v13 = vadd.f32 %v99_v12, %v98_v10  ;;  %103 = vst [vmem:[%s187_s3] sm:$0xff] %v101_v11 }
   0xb   :  { %107 = vst [vmem:[%s188_s4] sm:$0xff] %v105_v13 }

</bundles_post_ra>
